<compile_context>
chip_gen: v7x
topology: tpu7x:2x2x1
jax: 0.10.0
libtpu: 0.0.40
codegen_flags: <defaults>
</compile_context>

<pallas_src>
import math

import jax
import jax.numpy as jnp
from jax.experimental import pallas as pl
from jax.experimental.pallas import tpu as pltpu

LN_EPS = 1e-6
TEMPERATURE = 0.2
MARGIN = 0.8
PGD_ALPHA = 0.01
PGD_STEPS = 10
N_CLASSES = 3


# --------------------------- VMEM budgeting (generation-aware) ---------------------------

def _vmem_limit_bytes():
    """Scoped-VMEM limit for the memory-bound launch: ~48 MiB on 128 MiB parts
    (v5e/v6e), ~24 MiB on 64 MiB parts (v7x per-core)."""
    try:
        cap = int(pltpu.get_tpu_info().vmem_capacity_bytes)
    except Exception:
        cap = 64 << 20  # conservative default (v7x per-TensorCore)
    limit = max(24 << 20, cap * 3 // 8)
    return int(min(limit, cap - (8 << 20)))


def _pick_batch_tile(B, S, D, in_elem_bytes, budget_bytes):
    """Rows per grid step for kernel 1.

    Auto-pipelined footprint per step = 2 inputs x 2 pipeline buffers x (tb,S,D)
    (+ tiny (tb,D) outputs).  A partial last block is allowed (batch rows are
    independent), so tb only needs to be 8-aligned, not a divisor of B.
    """
    per_row = 2 * 2 * S * D * in_elem_bytes
    cap_rows = max(8, int(budget_bytes // per_row) // 8 * 8)
    if B <= 8:
        return B                                   # block dim == full array dim
    tb = min(cap_rows, max(8, (B // 8) * 8))
    if B >= 16:
        # keep >=2 grid steps so both v7x TensorCores get work (no-op on v5e/v6e)
        tb = min(tb, max(8, ((B // 2) // 8) * 8))
    return tb


# --------------------------- kernel 1: LN+ReLU + sequence mean ---------------------------

def _ln_mean_kernel(slhs_ref, aspect_ref, g_ref, b_ref, orig_ref, aspect_out_ref):
    x = slhs_ref[...].astype(jnp.float32)                    # (TB, S, D), upcast once
    d = x.shape[-1]
    g = jnp.reshape(g_ref[...], (1, 1, d))
    bta = jnp.reshape(b_ref[...], (1, 1, d))
    mean = jnp.mean(x, axis=-1, keepdims=True)
    diff = x - mean
    # torch .std(): unbiased (N-1) denominator, eps added to std
    var = jnp.sum(diff * diff, axis=-1, keepdims=True) / (d - 1)
    inv = 1.0 / (jnp.sqrt(var) + LN_EPS)                     # per-row reciprocal (TB,S,1)
    y = jnp.maximum(g * (diff * inv) + bta, 0.0)             # relu; dropout = identity
    # F.avg_pool1d over the full sequence == mean over S
    orig_ref[...] = jnp.mean(y, axis=1)                      # (TB, D)
    aspect_out_ref[...] = jnp.mean(aspect_ref[...].astype(jnp.float32), axis=1)


def ln_relu_seqmean(slhs, aspect, gamma, beta):
    B, S, D = slhs.shape
    vmem_limit = _vmem_limit_bytes()
    in_bytes = max(jnp.dtype(slhs.dtype).itemsize, jnp.dtype(aspect.dtype).itemsize)
    tb = _pick_batch_tile(B, S, D, in_bytes, vmem_limit - (4 << 20))
    g2 = gamma.reshape(1, D).astype(jnp.float32)
    b2 = beta.reshape(1, D).astype(jnp.float32)
    out_shape = (jax.ShapeDtypeStruct((B, D), jnp.float32),
                 jax.ShapeDtypeStruct((B, D), jnp.float32))
    return pl.pallas_call(
        _ln_mean_kernel,
        grid=(pl.cdiv(B, tb),),
        in_specs=[pl.BlockSpec((tb, S, D), lambda i: (i, 0, 0)),
                  pl.BlockSpec((tb, S, D), lambda i: (i, 0, 0)),
                  pl.BlockSpec((1, D), lambda i: (0, 0)),
                  pl.BlockSpec((1, D), lambda i: (0, 0))],
        out_specs=(pl.BlockSpec((tb, D), lambda i: (i, 0)),
                   pl.BlockSpec((tb, D), lambda i: (i, 0))),
        out_shape=out_shape,
        compiler_params=pltpu.CompilerParams(
            dimension_semantics=("parallel",),
            vmem_limit_bytes=vmem_limit),
    )(slhs, aspect, g2, b2)                                   # inputs in native dtype


# --------------------------- kernel 2: fused vector-sized tail ---------------------------

def _tail_kernel(pooler_ref, orig_ref, aspect_ref, g_ref, b_ref,
                 fcw_ref, fcb_ref, xlw_ref, xlb_ref, y_ref,
                 x_ref, losses_ref, ovuo_ref, pert_ref):
    g = g_ref[...]                                            # (1, D)
    bta = b_ref[...]                                          # (1, D)

    def layernorm(v, relu):
        d = v.shape[-1]
        mean = jnp.mean(v, axis=-1, keepdims=True)
        diff = v - mean
        var = jnp.sum(diff * diff, axis=-1, keepdims=True) / (d - 1)
        inv = 1.0 / (jnp.sqrt(var) + LN_EPS)                  # per-row reciprocal
        out = g * (diff * inv) + bta
        return jnp.maximum(out, 0.0) if relu else out

    # ---- pooler chain: LN -> relu(LN) -> relu(LN)  (dropouts = identity) ----
    p1 = layernorm(pooler_ref[...].astype(jnp.float32), False)   # layernorm(pooler_output)
    p2 = layernorm(p1, True)                                     # sentence_pooler_output
    ovuo_drop = layernorm(p2, True)                              # original_vector_uni_one_drop

    # ---- project_tensor(aspect_vector, original_vector) ----
    asp = aspect_ref[...]
    ov = orig_ref[...]
    dot_ab = jnp.sum(asp * ov, axis=-1, keepdims=True)
    bnorm2 = jnp.sum(ov * ov, axis=-1, keepdims=True)
    # TODO(synk): tiny floor on ||b||^2 avoids NaN poisoning when a mean-of-ReLU row is
    #             exactly zero (torch would produce NaN there).
    ovuo = jnp.maximum(dot_ab / jnp.maximum(bnorm2, 1e-12) * ov, 0.0)
    ovuo_ref[...] = ovuo

    # ---- fc / PGD (weights kept lane-dense as (C, D)) ----
    w_cd = fcw_ref[...]                                       # (C, D)
    fcb = fcb_ref[...]                                        # (1, C)
    y_onehot = y_ref[...]                                     # (B, C)
    n_cls = w_cd.shape[0]

    # PGD: the C=3 logits live on the VPU/XLU (lane reductions) so none of the 10
    # strictly serial steps pays an MXU push/pop round-trip on the dependency chain.
    w_rows = [w_cd[c:c + 1, :] for c in range(n_cls)]         # (1, D) each
    b_vals = [fcb[:, c:c + 1] for c in range(n_cls)]          # (1, 1) each
    y_cols = [y_onehot[:, c:c + 1] for c in range(n_cls)]     # (B, 1) each

    def pgd_step(_, v):
        logits = [jnp.sum(v * w_rows[c], axis=-1, keepdims=True) + b_vals[c]
                  for c in range(n_cls)]                      # (B, 1) each
        m = logits[0]
        for c in range(1, n_cls):
            m = jnp.maximum(m, logits[c])
        es = [jnp.exp(l - m) for l in logits]
        tot = es[0]
        for c in range(1, n_cls):
            tot = tot + es[c]
        inv = 1.0 / tot                                       # exact softmax denominator
        grad = (es[0] * inv - y_cols[0]) * w_rows[0]          # d CE(softmax(vW^T+b), y) / dv
        for c in range(1, n_cls):
            grad = grad + (es[c] * inv - y_cols[c]) * w_rows[c]
        return v + PGD_ALPHA * jnp.sign(grad)

    pert = jax.lax.fori_loop(0, PGD_STEPS, pgd_step, ovuo, unroll=True)
    pert_ref[...] = pert

    # ---- x = fc(relu(ovuo)); torch_x = x_liner(x) ----
    x = jax.lax.dot_general(jnp.maximum(ovuo, 0.0), w_cd, (((1,), (1,)), ((), ())),
                            preferred_element_type=jnp.float32) + fcb      # (B, C)
    x_ref[...] = x
    torch_x = x[:, 0:1] * xlw_ref[0:1, :]                     # (B, D) VPU FMA
    for c in range(1, n_cls):
        torch_x = torch_x + x[:, c:c + 1] * xlw_ref[c:c + 1, :]
    torch_x = torch_x + xlb_ref[...]

    # ---- ContrastiveLoss(ovuo, ovuo_drop, pert) ----
    def rownorm(v):
        n = jnp.sqrt(jnp.sum(v * v, axis=-1, keepdims=True))
        return v / jnp.maximum(n, 1e-12)

    z_i = rownorm(ovuo)
    z_j = rownorm(ovuo_drop)
    z_k = rownorm(pert)
    half_b = z_i.shape[0]
    inv_t = 1.0 / TEMPERATURE

    def xyt(u, v):                                            # (B, D) @ (B, D)^T -> (B, B)
        return jax.lax.dot_general(u, v, (((1,), (1,)), ((), ())),
                                   preferred_element_type=jnp.float32)

    # similarity matrix in 2x2 block form; s_ji == s_ij^T so only 3 blocks are built
    e_ii = jnp.exp(xyt(z_i, z_i) * inv_t)
    e_ij = jnp.exp(xyt(z_i, z_j) * inv_t)
    e_jj = jnp.exp(xyt(z_j, z_j) * inv_t)                     # symmetric

    rr = jax.lax.broadcasted_iota(jnp.int32, e_ii.shape, 0)
    cc = jax.lax.broadcasted_iota(jnp.int32, e_ii.shape, 1)
    offdiag = (rr != cc).astype(jnp.float32)                  # negatives_mask (block form)

    denom_top = (jnp.sum(offdiag * e_ii, axis=-1, keepdims=True)
                 + jnp.sum(e_ij, axis=-1, keepdims=True))                   # (B, 1)
    # bottom-half rows: row sums of e_ji == column sums of e_ij; e_jj is symmetric,
    # so its masked row sums equal its masked column sums.  Kept in (1, B) layout.
    denom_bot = (jnp.sum(e_ij, axis=0, keepdims=True)
                 + jnp.sum(offdiag * e_jj, axis=0, keepdims=True))          # (1, B)

    # positives = [diag(sim,+B); diag(sim,-B)] = rowdot(z_i, z_j) duplicated
    d_ij = jnp.sum(z_i * z_j, axis=-1, keepdims=True)         # (B, 1)
    log_nom = d_ij * inv_t                                    # log(exp(pos / T))
    # fu term: rowdot(z_k, z_i) duplicated; reference sums exp(fu/T) over (2B,) -> scalar
    d_ki = jnp.sum(z_k * z_i, axis=-1, keepdims=True)
    denom_fu = 2.0 * jnp.sum(jnp.exp(d_ki * inv_t), keepdims=True)          # (1, 1)

    sum_log_nom = jnp.sum(log_nom, keepdims=True)                           # (1, 1)
    loss_top = jnp.sum(jnp.log(denom_top + denom_fu), keepdims=True) - sum_log_nom
    loss_bot = jnp.sum(jnp.log(denom_bot + denom_fu), keepdims=True) - sum_log_nom
    closs = (loss_top + loss_bot) / (2.0 * half_b)                          # (1, 1)

    # ---- TripletLoss(torch_x, ovuo, aspect_vector) ----
    eps = 1e-8

    def cos(u, v):
        num = jnp.sum(u * v, axis=-1, keepdims=True)
        nu = jnp.maximum(jnp.sqrt(jnp.sum(u * u, axis=-1, keepdims=True)), eps)
        nv = jnp.maximum(jnp.sqrt(jnp.sum(v * v, axis=-1, keepdims=True)), eps)
        return num / (nu * nv)

    pos_dist = 1.0 - cos(torch_x, ovuo)
    neg_dist = 1.0 - cos(torch_x, asp)
    hinge = jnp.maximum(MARGIN + pos_dist - neg_dist, 0.0)
    tloss = jnp.sum(hinge, keepdims=True) / hinge.shape[0]                  # (1, 1)

    # pack both scalar losses into one lane-dense (1, 128) output row
    lane = jax.lax.broadcasted_iota(jnp.int32, losses_ref.shape, 1)
    losses_ref[...] = (jnp.where(lane == 0, closs, 0.0)
                       + jnp.where(lane == 1, tloss, 0.0))


def _full_block_specs(arrays):
    return [pl.BlockSpec(x.shape, lambda i, nd=x.ndim: (0,) * nd) for x in arrays]


def _tail_call(pooler, orig_vec, aspect_vec, gamma2, beta2,
               fc_w, fc_b, xl_w, xl_b, onehot):
    B, D = orig_vec.shape
    C = fc_w.shape[0]
    inputs = (pooler, orig_vec, aspect_vec, gamma2, beta2, fc_w, fc_b, xl_w, xl_b, onehot)
    out_shape = (
        jax.ShapeDtypeStruct((B, C), jnp.float32),            # x (logits)
        jax.ShapeDtypeStruct((1, 128), jnp.float32),          # [contrast_loss, loss_tri, 0...]
        jax.ShapeDtypeStruct((B, D), jnp.float32),            # original_vector_uni_one
        jax.ShapeDtypeStruct((B, D), jnp.float32),            # perturbed_vector
    )
    out_specs = tuple(pl.BlockSpec(s.shape, lambda i, nd=len(s.shape): (0,) * nd)
                      for s in out_shape)
    return pl.pallas_call(
        _tail_kernel,
        grid=(1,),
        in_specs=_full_block_specs(inputs),
        out_specs=out_specs,
        out_shape=out_shape,
    )(*inputs)


# --------------------------- model glue ---------------------------

def init_params(key, d_model, n_classes):
    k1, k2, k3, k4 = jax.random.split(key, 4)
    s_fc = 1.0 / math.sqrt(d_model)
    s_xl = 1.0 / math.sqrt(n_classes)
    return {
        "ln_gamma": jnp.ones((d_model,), jnp.float32),
        "ln_beta": jnp.zeros((d_model,), jnp.float32),
        # self.fc = nn.Linear(768, 3) -> weight stored lane-dense as (C, D)
        "fc_w": jax.random.uniform(k1, (n_classes, d_model), jnp.float32, -s_fc, s_fc),
        "fc_b": jax.random.uniform(k2, (1, n_classes), jnp.float32, -s_fc, s_fc),
        # self.x_liner = nn.Linear(3, 768) -> stored as (in, out) = (C, D)
        "xliner_w": jax.random.uniform(k3, (n_classes, d_model), jnp.float32, -s_xl, s_xl),
        "xliner_b": jax.random.uniform(k4, (1, d_model), jnp.float32, -s_xl, s_xl),
    }


def aen_bert_forward(params, sentence_last_hidden_state, sentence_pooler_output_raw,
                     aspect_one_sentence_hidden, target_label):
    B, S, D = sentence_last_hidden_state.shape
    g, bta = params["ln_gamma"], params["ln_beta"]

    # (B,S,D) path: fused LN+ReLU of the sentence stream + sequence-mean of both streams.
    # Inputs are passed in their native (e.g. bf16) dtype and upcast inside the kernel.
    original_vector, aspect_vector = ln_relu_seqmean(
        sentence_last_hidden_state, aspect_one_sentence_hidden, g, bta)

    onehot = jnp.eye(N_CLASSES, dtype=jnp.float32)[target_label]

    x, losses, ovuo, perturbed = _tail_call(
        sentence_pooler_output_raw,
        original_vector, aspect_vector,
        g.reshape(1, D).astype(jnp.float32), bta.reshape(1, D).astype(jnp.float32),
        params["fc_w"], params["fc_b"], params["xliner_w"], params["xliner_b"],
        onehot)

    contrast_loss = losses[0, 0]
    loss_tri = losses[0, 1]
    return x, contrast_loss, loss_tri, ovuo, perturbed


# --------------------------- main ---------------------------

if __name__ == "__main__":
    B, S, D = 2, 8, 32  # small stand-ins for (batch, seq=60, bert_dim=768)
    key = jax.random.PRNGKey(0)
    kp, k1, k2, k3, k4 = jax.random.split(key, 5)

    params = init_params(kp, D, N_CLASSES)
    # BERT activations in their native bf16 dtype (kernel 1 upcasts in-register)
    sentence_last_hidden_state = jax.random.normal(k1, (B, S, D), jnp.bfloat16)
    sentence_pooler_output = jax.random.normal(k2, (B, D), jnp.bfloat16)
    aspect_one_sentence_hidden = jax.random.normal(k3, (B, S, D), jnp.bfloat16)
    target_label = jax.random.randint(k4, (B,), 0, N_CLASSES)

    outs = aen_bert_forward(params, sentence_last_hidden_state, sentence_pooler_output,
                            aspect_one_sentence_hidden, target_label)
    outs = jax.tree_util.tree_map(jax.block_until_ready, outs)
    print("KERNEL_OK")
</pallas_src>

<mosaic_0001>
module attributes {stable_mosaic.version = 11 : i64} {
  func.func @_ln_mean_kernel(%arg0: i32, %arg1: memref<2x8x32xbf16, #tpu.memory_space<vmem>>, %arg2: memref<2x8x32xbf16, #tpu.memory_space<vmem>>, %arg3: memref<1x32xf32, #tpu.memory_space<vmem>>, %arg4: memref<1x32xf32, #tpu.memory_space<vmem>>, %arg5: memref<2x32xf32, #tpu.memory_space<vmem>>, %arg6: memref<2x32xf32, #tpu.memory_space<vmem>>) attributes {dimension_semantics = [#tpu.dimension_semantics<parallel>], iteration_bounds = array<i64: 1>, scalar_prefetch = 0 : i64, scratch_operands = 0 : i64, tpu.core_type = #tpu.core_type<tc>, window_params = [{transform_indices = @transform_0, window_bounds = array<i64: 2, 8, 32>}, {transform_indices = @transform_1, window_bounds = array<i64: 2, 8, 32>}, {pipeline_mode = #tpu.pipeline_mode<synchronous>, transform_indices = @transform_2, window_bounds = array<i64: 1, 32>}, {pipeline_mode = #tpu.pipeline_mode<synchronous>, transform_indices = @transform_3, window_bounds = array<i64: 1, 32>}, {transform_indices = @transform_4, window_bounds = array<i64: 2, 32>}, {transform_indices = @transform_5, window_bounds = array<i64: 2, 32>}]} {
    %c0 = arith.constant 0 : index
    %c0_0 = arith.constant 0 : index
    %c0_1 = arith.constant 0 : index
    %0 = vector.load %arg1[%c0, %c0_0, %c0_1] : memref<2x8x32xbf16, #tpu.memory_space<vmem>>, vector<2x8x32xbf16>
    %1 = arith.extf %0 : vector<2x8x32xbf16> to vector<2x8x32xf32>
    %c0_2 = arith.constant 0 : index
    %c0_3 = arith.constant 0 : index
    %2 = vector.load %arg3[%c0_2, %c0_3] : memref<1x32xf32, #tpu.memory_space<vmem>>, vector<1x32xf32>
    %3 = vector.shape_cast %2 : vector<1x32xf32> to vector<1x1x32xf32>
    %c0_4 = arith.constant 0 : index
    %c0_5 = arith.constant 0 : index
    %4 = vector.load %arg4[%c0_4, %c0_5] : memref<1x32xf32, #tpu.memory_space<vmem>>, vector<1x32xf32>
    %5 = vector.shape_cast %4 : vector<1x32xf32> to vector<1x1x32xf32>
    %cst = arith.constant dense<0.000000e+00> : vector<2x8xf32>
    %6 = vector.multi_reduction <add>, %1, %cst [2] : vector<2x8x32xf32> to vector<2x8xf32>
    %7 = vector.shape_cast %6 : vector<2x8xf32> to vector<2x8x1xf32>
    %cst_6 = arith.constant 3.200000e+01 : f32
    %8 = vector.broadcast %cst_6 : f32 to vector<2x8x1xf32>
    %9 = arith.divf %7, %8 : vector<2x8x1xf32>
    %10 = vector.broadcast %9 : vector<2x8x1xf32> to vector<2x8x32xf32>
    %11 = arith.subf %1, %10 : vector<2x8x32xf32>
    %12 = arith.mulf %11, %11 : vector<2x8x32xf32>
    %cst_7 = arith.constant dense<0.000000e+00> : vector<2x8xf32>
    %13 = vector.multi_reduction <add>, %12, %cst_7 [2] : vector<2x8x32xf32> to vector<2x8xf32>
    %14 = vector.shape_cast %13 : vector<2x8xf32> to vector<2x8x1xf32>
    %cst_8 = arith.constant 3.100000e+01 : f32
    %15 = vector.broadcast %cst_8 : f32 to vector<2x8x1xf32>
    %16 = arith.divf %14, %15 : vector<2x8x1xf32>
    %17 = math.sqrt %16 : vector<2x8x1xf32>
    %cst_9 = arith.constant 9.99999997E-7 : f32
    %18 = vector.broadcast %cst_9 : f32 to vector<2x8x1xf32>
    %19 = arith.addf %17, %18 : vector<2x8x1xf32>
    %cst_10 = arith.constant 1.000000e+00 : f32
    %20 = vector.broadcast %cst_10 : f32 to vector<2x8x1xf32>
    %21 = arith.divf %20, %19 : vector<2x8x1xf32>
    %22 = vector.broadcast %21 : vector<2x8x1xf32> to vector<2x8x32xf32>
    %23 = arith.mulf %11, %22 : vector<2x8x32xf32>
    %24 = vector.broadcast %3 : vector<1x1x32xf32> to vector<2x8x32xf32>
    %25 = arith.mulf %24, %23 : vector<2x8x32xf32>
    %26 = vector.broadcast %5 : vector<1x1x32xf32> to vector<2x8x32xf32>
    %27 = arith.addf %25, %26 : vector<2x8x32xf32>
    %cst_11 = arith.constant 0.000000e+00 : f32
    %28 = vector.broadcast %cst_11 : f32 to vector<2x8x32xf32>
    %29 = arith.maximumf %27, %28 : vector<2x8x32xf32>
    %cst_12 = arith.constant dense<0.000000e+00> : vector<2x32xf32>
    %30 = vector.multi_reduction <add>, %29, %cst_12 [1] : vector<2x8x32xf32> to vector<2x32xf32>
    %cst_13 = arith.constant 8.000000e+00 : f32
    %31 = vector.broadcast %cst_13 : f32 to vector<2x32xf32>
    %32 = arith.divf %30, %31 : vector<2x32xf32>
    %c0_14 = arith.constant 0 : index
    %c0_15 = arith.constant 0 : index
    %33 = vector.load %arg5[%c0_14, %c0_15] : memref<2x32xf32, #tpu.memory_space<vmem>>, vector<2x32xf32>
    tpu.vector_store %arg5[%c0_14, %c0_15], %32 {strides = array<i32>} : memref<2x32xf32, #tpu.memory_space<vmem>>, vector<2x32xf32>,
    %c0_16 = arith.constant 0 : index
    %c0_17 = arith.constant 0 : index
    %c0_18 = arith.constant 0 : index
    %34 = vector.load %arg2[%c0_16, %c0_17, %c0_18] : memref<2x8x32xbf16, #tpu.memory_space<vmem>>, vector<2x8x32xbf16>
    %35 = arith.extf %34 : vector<2x8x32xbf16> to vector<2x8x32xf32>
    %cst_19 = arith.constant dense<0.000000e+00> : vector<2x32xf32>
    %36 = vector.multi_reduction <add>, %35, %cst_19 [1] : vector<2x8x32xf32> to vector<2x32xf32>
    %cst_20 = arith.constant 8.000000e+00 : f32
    %37 = vector.broadcast %cst_20 : f32 to vector<2x32xf32>
    %38 = arith.divf %36, %37 : vector<2x32xf32>
    %c0_21 = arith.constant 0 : index
    %c0_22 = arith.constant 0 : index
    %39 = vector.load %arg6[%c0_21, %c0_22] : memref<2x32xf32, #tpu.memory_space<vmem>>, vector<2x32xf32>
    tpu.vector_store %arg6[%c0_21, %c0_22], %38 {strides = array<i32>} : memref<2x32xf32, #tpu.memory_space<vmem>>, vector<2x32xf32>,
    return
  }
  func.func @transform_0(%arg0: i32) -> (i32, i32, i32) {
    %c0_i32 = arith.constant 0 : i32
    %c0_i32_0 = arith.constant 0 : i32
    %c0_i32_1 = arith.constant 0 : i32
    return %arg0, %c0_i32, %c0_i32_0 : i32, i32, i32
  }
  func.func @transform_1(%arg0: i32) -> (i32, i32, i32) {
    %c0_i32 = arith.constant 0 : i32
    %c0_i32_0 = arith.constant 0 : i32
    %c0_i32_1 = arith.constant 0 : i32
    return %arg0, %c0_i32, %c0_i32_0 : i32, i32, i32
  }
  func.func @transform_2(%arg0: i32) -> (i32, i32) {
    %c0_i32 = arith.constant 0 : i32
    %c0_i32_0 = arith.constant 0 : i32
    %c0_i32_1 = arith.constant 0 : i32
    return %c0_i32, %c0_i32_0 : i32, i32
  }
  func.func @transform_3(%arg0: i32) -> (i32, i32) {
    %c0_i32 = arith.constant 0 : i32
    %c0_i32_0 = arith.constant 0 : i32
    %c0_i32_1 = arith.constant 0 : i32
    return %c0_i32, %c0_i32_0 : i32, i32
  }
  func.func @transform_4(%arg0: i32) -> (i32, i32) {
    %c0_i32 = arith.constant 0 : i32
    %c0_i32_0 = arith.constant 0 : i32
    return %arg0, %c0_i32 : i32, i32
  }
  func.func @transform_5(%arg0: i32) -> (i32, i32) {
    %c0_i32 = arith.constant 0 : i32
    %c0_i32_0 = arith.constant 0 : i32
    return %arg0, %c0_i32 : i32, i32
  }
}

</mosaic_0001>

<bundles_post_ra>
// kernel: tpu_custom_call.1
= control target key start
LH: loop header
LB: loop body
LE: loop exit
PB: predicated region body
PF: predicated region fallthrough
CT: control target
= control target key end

     0   :  { %11 = vsyncpa [#allocation3], 0  ;;  %s429_s0 = inlined_call_operand.hbm [shape: bf16[2,8,32], index: 0, kind: input, shape index: {}]   ;;  %s430_s1 = inlined_call_operand.hbm [shape: bf16[2,8,32], index: 1, kind: input, shape index: {}]   ;;  %s431_s2 = inlined_call_operand.vmem [shape: f32[1,32], index: 2, kind: input, shape index: {}]   ;;  %s432_s3 = inlined_call_operand.vmem [shape: f32[1,32], index: 3, kind: input, shape index: {}]   ;;  %s433_s4 = inlined_call_operand.hbm [shape: f32[2,32], index: 4, kind: output, shape index: {0}]   ;;  %s434_s5 = inlined_call_operand.hbm [shape: f32[2,32], index: 5, kind: output, shape index: {1}]  }
   0x1   :  { %12 = vsyncpa [#allocation6], 0 }
   0x2   :  { %13 = vsyncpa [#allocation4], 0 }
   0x3   :  { %14 = vsyncpa [#allocation9], 0  ;;  %s317_s18 = smov [#allocation2]   ;;  %s221_s22 = scalar_lea.hbm %s429_s0, 128 }
   0x4   :  { %s20_s19 = sshll.u32 %s317_s18, 4  ;;  %p222_p0 = scmp.ne.s32.totalorder %s429_s0, %s221_s22  ;;  %s21_s19 = int_to_ptr.vmem [resolvable:$true] %s20_s19 }
   0x5   :  { %p225_p1 = scmp.lt.u32.totalorder %s221_s22, %s429_s0 }
   0x7   :  { %p227_p2 = pnand %p225_p1, %p222_p0 }
   0x9   :  { %230 = shalt.err (!%p227_p2)
}
   0xa   :  { %s231_s27 = scalar_lea.vmem %s21_s19, 128  ;;  %p236_p4 = scmp.lt.s32.totalorder %s21_s19, %s21_s19 }
   0xb   :  { %p232_p3 = scmp.ne.s32.totalorder %s21_s19, %s231_s27  ;;  %p237_p5 = scmp.lt.s32.totalorder %s231_s27, %s231_s27 }
   0xd   :  { %p238_p6 = por %p237_p5, %p236_p4 }
   0xf   :  { %p239_p7 = pnand %p238_p6, %p232_p3 }
  0x11   :  { %242 = shalt.err (!%p239_p7)
}
  0x12   :  { %s318_s28 = smov 64   ;;  %s319_s29 = smov 4  }
  0x13   :  { %26 = dma.hbm_to_vmem [thread:$0]  %s429_s0, 128, %s21_s19, [#allocation3], %s318_s28, %s318_s28, %s319_s29  }
  0x14   :  { %s320_s7 = smov [#allocation5]   ;;  %s243_s11 = scalar_lea.hbm %s430_s1, 128 }
  0x15   :  { %s32_s8 = sshll.u32 %s320_s7, 4  ;;  %p244_p8 = scmp.ne.s32.totalorder %s430_s1, %s243_s11  ;;  %s33_s8 = int_to_ptr.vmem [resolvable:$true] %s32_s8 }
  0x16   :  { %p247_p9 = scmp.lt.u32.totalorder %s243_s11, %s430_s1 }
  0x18   :  { %p249_p10 = pnand %p247_p9, %p244_p8 }
  0x1a   :  { %252 = shalt.err (!%p249_p10)
}
  0x1b   :  { %s253_s16 = scalar_lea.vmem %s33_s8, 128  ;;  %p258_p12 = scmp.lt.s32.totalorder %s33_s8, %s33_s8 }
  0x1c   :  { %p254_p11 = scmp.ne.s32.totalorder %s33_s8, %s253_s16  ;;  %p259_p13 = scmp.lt.s32.totalorder %s253_s16, %s253_s16 }
  0x1e   :  { %p260_p0 = por %p259_p13, %p258_p12 }
  0x20   :  { %p261_p1 = pnand %p260_p0, %p254_p11 }
  0x22   :  { %264 = shalt.err (!%p261_p1)
}
  0x23   :  { %38 = dma.hbm_to_vmem [thread:$0]  %s430_s1, 128, %s33_s8, [#allocation6], %s318_s28, %s318_s28, %s319_s29  }
  0x24   :  { %309 = dma.done.wait [#allocation3], 128  }
  0x25   :  { %310 = vsyncadd [#allocation3], 4294967168 }
  0x26   :  { %311 = dma.done.wait [#allocation6], 128  }
  0x27   :  { %312 = vsyncadd [#allocation6], 4294967168  ;;  %v200_v0 = vld [vmem:[#allocation2] sm:$0xff]   ;;  %vm55_vm0 = vcmask 261120   ;;  %v204_v15 = vld [vmem:[#allocation5] sm:$0xff]   ;;  %vm137_vm1 = vcmask 1041409  }
  0x28   :  { %v201_v1 = vunpack.c.l.bf16 %v200_v0  ;;  %v202_v2 = vunpack.c.h.bf16 %v200_v0  ;;  %v205_v16 = vunpack.c.l.bf16 %v204_v15  ;;  %v206_v17 = vunpack.c.h.bf16 %v204_v15  ;;  %s321_s1 = smov [#allocation8]  }
  0x29   :  { %vm140_vm2 = vcmask 254976   ;;  %s183_s18 = sshll.u32 %s321_s1, 4  ;;  %s184_s18 = int_to_ptr.vmem [resolvable:$true] %s183_s18 }
  0x2a   :  { %v56_v3 = vsel %vm55_vm0, %v201_v1, 0.0  ;;  %v59_v4 = vsel %vm55_vm0, %v202_v2, 0.0  ;;  %v146_v18 = vsel %vm55_vm0, %v205_v16, 0.0  ;;  %v153_v19 = vsel %vm55_vm0, %v206_v17, 0.0  ;;  %s265_s19 = scalar_lea.vmem %s184_s18, 32  ;;  %p270_p3 = scmp.lt.s32.totalorder %s184_s18, %s184_s18 }
  0x2b   :  { %57 = vadd.xlane.f32.xlu0 %v56_v3  ;;  %v147_v20 = vrot.slane %v146_v18, 4  ;;  %v154_v21 = vrot.slane %v153_v19, 4  ;;  %p266_p2 = scmp.ne.s32.totalorder %s184_s18, %s265_s19  ;;  %p271_p4 = scmp.lt.s32.totalorder %s265_s19, %s265_s19 }
  0x2d   :  { %v148_v22 = vadd.f32 %v147_v20, %v146_v18  ;;  %v155_v23 = vadd.f32 %v154_v21, %v153_v19  ;;  %p272_p5 = por %p271_p4, %p270_p3 }
  0x2f   :  { %60 = vadd.xlane.f32.xlu0 %v59_v4  ;;  %v149_v24 = vrot.slane %v148_v22, 2  ;;  %v156_v25 = vrot.slane %v155_v23, 2  ;;  %p273_p6 = pnand %p272_p5, %p266_p2 }
  0x31   :  { %v150_v26 = vadd.f32 %v149_v24, %v148_v22  ;;  %v157_v27 = vadd.f32 %v156_v25, %v155_v23 }
  0x33   :  { %v151_v28 = vrot.slane %v150_v26, 1  ;;  %v158_v29 = vrot.slane %v157_v27, 1 }
  0x35   :  { %v152_v30 = vadd.f32 %v151_v28, %v150_v26  ;;  %v159_v31 = vadd.f32 %v158_v29, %v157_v27 }
  0x37   :  { %v160_v32 = vmul.f32 0.125, %v152_v30  ;;  %v161_v33 = vmul.f32 0.125, %v159_v31 }
  0x39   :  { %v164_v34 = vsel %vm137_vm1, %v161_v33, %v160_v32 }
  0x3a   :  { %166 = vst.msk [vmem:[#allocation8] sm:$0x3] %vm140_vm2, %v164_v34 }
  0xb8   :  { %v58_v5 = vpop.xlane.xlu0 %57 }
  0xb9   :  { %v63_v6 = vmul.f32 0.03125, %v58_v5 }
  0xbb   :  { %v379_v7 = vsub.f32 %v201_v1, %v63_v6 }
  0xbc   :  { %v61_v8 = vpop.xlane.xlu0 %60 }
  0xbd   :  { %v64_v9 = vmul.f32 0.03125, %v61_v8  ;;  %v67_v10 = vmul.f32 %v379_v7, %v379_v7 }
  0xbf   :  { %v383_v11 = vsub.f32 %v202_v2, %v64_v9  ;;  %v69_v12 = vsel %vm55_vm0, %v67_v10, 0.0 }
  0xc0   :  { %70 = vadd.xlane.f32.xlu1 %v69_v12 }
  0xc1   :  { %v68_v13 = vmul.f32 %v383_v11, %v383_v11 }
  0xc3   :  { %v72_v14 = vsel %vm55_vm0, %v68_v13, 0.0 }
  0xc4   :  { %73 = vadd.xlane.f32.xlu1 %v72_v14 }
  0xc5   :  { %276 = shalt.err (!%p273_p6)
}
  0xc6   :  { %s277_s22 = scalar_lea.hbm %s434_s5, 32 }
  0xc7   :  { %p278_p7 = scmp.ne.s32.totalorder %s434_s5, %s277_s22  ;;  %p281_p8 = scmp.lt.u32.totalorder %s277_s22, %s434_s5 }
  0xc9   :  { %p283_p9 = pnand %p281_p8, %p278_p7 }
  0xcb   :  { %286 = shalt.err (!%p283_p9)
}
  0xcc   :  { %186 = dma.vmem_to_hbm [thread:$0]  %s184_s18, 32, %s434_s5, [#allocation9]   ;;  %v197_v52 = vld [vmem:[%s431_s2] ss:$0 sm:$0xff] }
  0xcd   :  { %v198_v54 = vld [vmem:[%s432_s3] ss:$0 sm:$0xff]  ;;  %s322_s2 = smov [#allocation7]  }
  0xce   :  { %s173_s3 = sshll.u32 %s322_s2, 4  ;;  %s174_s3 = int_to_ptr.vmem [resolvable:$true] %s173_s3 }
  0xcf   :  { %s287_s7 = scalar_lea.vmem %s174_s3, 32  ;;  %p292_p11 = scmp.lt.s32.totalorder %s174_s3, %s174_s3 }
  0xd0   :  { %p288_p10 = scmp.ne.s32.totalorder %s174_s3, %s287_s7  ;;  %p293_p12 = scmp.lt.s32.totalorder %s287_s7, %s287_s7 }
  0xd2   :  { %p294_p13 = por %p293_p12, %p292_p11 }
  0xd4   :  { %p295_p0 = pnand %p294_p13, %p288_p10 }
 0x14d   :  { %v71_v35 = vpop.xlane.xlu1 %70 }
 0x14e   :  { %v76_v36 = vmul.f32 0.032258064, %v71_v35 }
 0x150   :  { %213 = vrsqrt.f32 %v76_v36  ;;  %vm80_vm3 = vcmp.eq.f32.partialorder %v76_v36, inf  ;;  %v83_v41 = vand.u32 2147483648, %v76_v36  ;;  %vm82_vm4 = vcmp.eq.f32.partialorder %v76_v36, 0.0 }
 0x151   :  { %v74_v37 = vpop.xlane.xlu1 %73 }
 0x152   :  { %v77_v38 = vmul.f32 0.032258064, %v74_v37 }
 0x154   :  { %215 = vrsqrt.f32 %v77_v38  ;;  %vm87_vm5 = vcmp.eq.f32.partialorder %v77_v38, inf  ;;  %v90_v47 = vand.u32 2147483648, %v77_v38  ;;  %vm89_vm6 = vcmp.eq.f32.partialorder %v77_v38, 0.0 }
 0x15a   :  { %v214_v39 = vpop.eup %213 }
 0x15b   :  { %v79_v40 = vmul.f32 %v214_v39, %v76_v36 }
 0x15d   :  { %v81_v42 = vsel %vm80_vm3, %v76_v36, %v79_v40 }
 0x15e   :  { %v216_v43 = vpop.eup %215  ;;  %v84_v44 = vsel %vm82_vm4, %v83_v41, %v81_v42 }
 0x15f   :  { %v92_v45 = vadd.f32 1e-06, %v84_v44  ;;  %v86_v46 = vmul.f32 %v216_v43, %v77_v38 }
 0x161   :  { %217 = vrcp.f32 %v92_v45  ;;  %v88_v48 = vsel %vm87_vm5, %v77_v38, %v86_v46 }
 0x162   :  { %v91_v49 = vsel %vm89_vm6, %v90_v47, %v88_v48 }
 0x163   :  { %v93_v50 = vadd.f32 1e-06, %v91_v49 }
 0x165   :  { %219 = vrcp.f32 %v93_v50 }
 0x16b   :  { %v218_v51 = vpop.eup %217 }
 0x16c   :  { %v98_v53 = vmul.f32 %v218_v51, %v379_v7 }
 0x16e   :  { %v106_v55 = vmul.f32 %v197_v52, %v98_v53 }
 0x16f   :  { %v220_v56 = vpop.eup %219 }
 0x170   :  { %v99_v57 = vmul.f32 %v220_v56, %v383_v11  ;;  %v114_v58 = vadd.f32 %v198_v54, %v106_v55 }
 0x172   :  { %v107_v59 = vmul.f32 %v197_v52, %v99_v57  ;;  %v116_v60 = vmax.f32 %v114_v58, 0.0 }
 0x174   :  { %v115_v61 = vadd.f32 %v198_v54, %v107_v59  ;;  %v118_v62 = vsel %vm55_vm0, %v116_v60, 0.0 }
 0x175   :  { %v119_v63 = vrot.slane %v118_v62, 4 }
 0x176   :  { %v117_v0 = vmax.f32 %v115_v61, 0.0 }
 0x177   :  { %v120_v1 = vadd.f32 %v119_v63, %v118_v62 }
 0x178   :  { %v125_v2 = vsel %vm55_vm0, %v117_v0, 0.0 }
 0x179   :  { %v121_v3 = vrot.slane %v120_v1, 2  ;;  %v126_v4 = vrot.slane %v125_v2, 4 }
 0x17b   :  { %v122_v5 = vadd.f32 %v121_v3, %v120_v1  ;;  %v127_v6 = vadd.f32 %v126_v4, %v125_v2 }
 0x17d   :  { %v123_v7 = vrot.slane %v122_v5, 1  ;;  %v128_v8 = vrot.slane %v127_v6, 2 }
 0x17f   :  { %v129_v9 = vadd.f32 %v128_v8, %v127_v6  ;;  %v124_v10 = vadd.f32 %v123_v7, %v122_v5 }
 0x181   :  { %v130_v11 = vrot.slane %v129_v9, 1  ;;  %v133_v13 = vmul.f32 0.125, %v124_v10 }
 0x183   :  { %v131_v12 = vadd.f32 %v130_v11, %v129_v9 }
 0x185   :  { %v134_v14 = vmul.f32 0.125, %v131_v12 }
 0x187   :  { %v138_v15 = vsel %vm137_vm1, %v134_v14, %v133_v13 }
 0x188   :  { %141 = vst.msk [vmem:[#allocation7] sm:$0x3] %vm140_vm2, %v138_v15 }
 0x189   :  { %298 = shalt.err (!%p295_p0)
}
 0x18a   :  { %s299_s10 = scalar_lea.hbm %s433_s4, 32 }
 0x18b   :  { %p300_p1 = scmp.ne.s32.totalorder %s433_s4, %s299_s10  ;;  %p303_p2 = scmp.lt.u32.totalorder %s299_s10, %s433_s4 }
 0x18d   :  { %p305_p3 = pnand %p303_p2, %p300_p1 }
 0x18f   :  { %308 = shalt.err (!%p305_p3)
}
 0x190   :  { %176 = dma.vmem_to_hbm [thread:$0]  %s174_s3, 32, %s433_s4, [#allocation4]  }
 0x191   :  { %313 = dma.done.wait [#allocation4], 32  }
 0x192   :  { %314 = vsyncadd [#allocation4], 4294967264 }
 0x193   :  { %315 = dma.done.wait [#allocation9], 32  }
 0x194   :  { %316 = vsyncadd [#allocation9], 4294967264 }
 0x195   :  { %193 = vsyncpa [#allocation3], 1 }
 0x196   :  { %194 = vsyncpa [#allocation6], 1 }
 0x197   :  { %195 = vsyncpa [#allocation4], 1 }
 0x198   :  { %196 = vsyncpa [#allocation9], 1 }

</bundles_post_ra>
